<compile_context>
chip_gen: v7x
topology: tpu7x:2x2x1
jax: 0.10.0
libtpu: 0.0.40
codegen_flags: <defaults>
</compile_context>

<pallas_src>
import jax
import jax.numpy as jnp
from jax.experimental import pallas as pl
from jax.experimental.pallas import tpu as pltpu


def _round_up(n: int, m: int) -> int:
    return ((n + m - 1) // m) * m


def _fold_bn(gamma, beta, mean, var, bias, eps):
    """Fold eval-mode BatchNorm1d + preceding Linear bias into (scale, shift)."""
    s = gamma / jnp.sqrt(var + eps)
    t = (bias - mean) * s + beta
    return s, t


# --------------------------------------------------------------------------------------
# Kernel: one batch tile of shape (TILE_B, Hp).
# --------------------------------------------------------------------------------------
def residual_block_kernel(x_ref, w1_ref, s1_ref, t1_ref, w2_ref, s2_ref, t2_ref, out_ref):
    x = x_ref[...]                                   # (TILE_B, Hp) f32
    x_bf16 = x.astype(jnp.bfloat16)                  # MXU operand only

    # Linear1 + (bias + eval BatchNorm folded into scale/shift)
    h = jnp.dot(x_bf16, w1_ref[...], preferred_element_type=jnp.float32)
    h = h * s1_ref[...] + t1_ref[...]
    # SiLU in f32; approx reciprocal goes to the EUP slot.
    h = h * pl.reciprocal(1.0 + jnp.exp(-h), approx=True)
    # TODO(synk): training-mode Dropout (pltpu.prng_random_bits) — identity in eval mode.
    # TODO(synk): training-mode BatchNorm (batch statistics) — running stats used here.

    # Linear2 + folded bias/BN
    y = jnp.dot(h.astype(jnp.bfloat16), w2_ref[...], preferred_element_type=jnp.float32)
    y = y * s2_ref[...] + t2_ref[...]

    # residual skip in f32 (module semantics) + final SiLU
    y = y + x
    out_ref[...] = (y * pl.reciprocal(1.0 + jnp.exp(-y), approx=True)).astype(out_ref.dtype)


# --------------------------------------------------------------------------------------
# One-time parameter preparation (hoisted out of the per-call forward path).
# --------------------------------------------------------------------------------------
def prepare_params(params, *, eps=1e-5):
    """Fold eval-mode BN into (scale, shift), pad to lane-dense Hp, cast weights to bf16."""
    H = params["w1"].shape[0]
    Hp = _round_up(H, 128)

    s1, t1 = _fold_bn(params["gamma1"], params["beta1"], params["mean1"],
                      params["var1"], params["b1"], eps)
    s2, t2 = _fold_bn(params["gamma2"], params["beta2"], params["mean2"],
                      params["var2"], params["b2"], eps)

    def pad_w(w):   # (H, H) f32 -> (Hp, Hp) bf16
        return jnp.pad(w, ((0, Hp - H), (0, Hp - H))).astype(jnp.bfloat16)

    def pad_v(v):   # (H,) f32 -> (1, Hp) f32
        return jnp.pad(v, (0, Hp - H)).reshape(1, Hp).astype(jnp.float32)

    return dict(w1=pad_w(params["w1"]), s1=pad_v(s1), t1=pad_v(t1),
                w2=pad_w(params["w2"]), s2=pad_v(s2), t2=pad_v(t2))


# --------------------------------------------------------------------------------------
# Forward wrapper
# --------------------------------------------------------------------------------------
def residual_block_forward(x, prep, *, max_tile_b=512, out_dtype=jnp.bfloat16):
    """x: (B, hidden_dim) f32.  prep: dict from prepare_params.  Returns (B, hidden_dim)."""
    B, H = x.shape
    Hp = prep["w1"].shape[0]
    assert Hp >= H and Hp % 128 == 0

    TILE_B = min(max_tile_b, _round_up(B, 8))
    grid = (pl.cdiv(B, TILE_B),)

    # Feature-dim padding only when H isn't lane-aligned; no batch padding, no cast pass.
    x_in = x if Hp == H else jnp.pad(x, ((0, 0), (0, Hp - H)))

    x_spec = pl.BlockSpec((TILE_B, Hp), lambda i: (i, 0))
    out_spec = pl.BlockSpec((TILE_B, Hp), lambda i: (i, 0))

    # Weights / scale-shift are VMEM-resident across batch tiles (constant index_map).
    weight_bytes = 2 * Hp * Hp * 2 + 4 * Hp * 4
    if weight_bytes > 8 * 2**20:
        # Large weights: single-buffer them (no re-DMA needed) to halve their VMEM footprint
        # — matters on v7x's 64 MiB VMEM.
        w_spec = pl.BlockSpec((Hp, Hp), lambda i: (0, 0), pipeline_mode=pl.Buffered(1))
        v_spec = pl.BlockSpec((1, Hp), lambda i: (0, 0), pipeline_mode=pl.Buffered(1))
        resident_weight_bytes = weight_bytes
    else:
        w_spec = pl.BlockSpec((Hp, Hp), lambda i: (0, 0))
        v_spec = pl.BlockSpec((1, Hp), lambda i: (0, 0))
        resident_weight_bytes = 2 * weight_bytes
    # TODO(synk): large-Hp fallback (K-tiled grid axis marked "arbitrary" + f32 VMEM
    # accumulator; optionally fp8 weights on v7x) once weights no longer fit resident.

    # VMEM budget: resident weights + double-buffered f32-in / bf16-out tiles + f32
    # intermediates, capped below physical VMEM to leave compiler-scratch headroom.
    out_bytes = jnp.dtype(out_dtype).itemsize
    tile_bytes = 2 * (TILE_B * Hp * 4 + TILE_B * Hp * out_bytes)
    interm_bytes = 4 * TILE_B * Hp * 4
    try:
        vmem_physical = pltpu.get_tpu_info().vmem_capacity_bytes
    except Exception:
        vmem_physical = 64 * 2**20
    vmem_cap = (vmem_physical * 3) // 4                       # never request full VMEM
    need = resident_weight_bytes + tile_bytes + interm_bytes
    vmem_limit = int(min(max(2 * need, 16 * 2**20), vmem_cap))

    cost = pl.CostEstimate(
        flops=2 * 2 * B * Hp * Hp,                   # two (TILE_B,Hp)x(Hp,Hp) matmuls
        transcendentals=2 * B * Hp,                  # two SiLU sigmoids
        bytes_accessed=B * Hp * 4 + B * Hp * out_bytes + weight_bytes,
    )

    out = pl.pallas_call(
        residual_block_kernel,
        out_shape=jax.ShapeDtypeStruct((B, Hp), out_dtype),
        grid=grid,
        in_specs=[x_spec, w_spec, v_spec, v_spec, w_spec, v_spec, v_spec],
        out_specs=out_spec,
        compiler_params=pltpu.CompilerParams(
            dimension_semantics=("parallel",),
            vmem_limit_bytes=vmem_limit,
        ),
        cost_estimate=cost,
    )(x_in, prep["w1"], prep["s1"], prep["t1"], prep["w2"], prep["s2"], prep["t2"])

    return out if Hp == H else out[:, :H]


# --------------------------------------------------------------------------------------
# Parameters (deterministic, nn.Linear-style init; weights stored as (in, out))
# --------------------------------------------------------------------------------------
def init_params(key, hidden_dim):
    ks = jax.random.split(key, 12)
    bound = 1.0 / (hidden_dim ** 0.5)

    def lin(kw, kb):
        w = jax.random.uniform(kw, (hidden_dim, hidden_dim), jnp.float32, -bound, bound)
        b = jax.random.uniform(kb, (hidden_dim,), jnp.float32, -bound, bound)
        return w, b

    def bn(kg, kb, km, kv):
        gamma = 1.0 + 0.1 * jax.random.normal(kg, (hidden_dim,), jnp.float32)
        beta = 0.1 * jax.random.normal(kb, (hidden_dim,), jnp.float32)
        mean = 0.1 * jax.random.normal(km, (hidden_dim,), jnp.float32)
        var = jax.random.uniform(kv, (hidden_dim,), jnp.float32, 0.5, 1.5)
        return gamma, beta, mean, var

    w1, b1 = lin(ks[0], ks[1])
    w2, b2 = lin(ks[2], ks[3])
    g1, be1, m1, v1 = bn(ks[4], ks[5], ks[6], ks[7])
    g2, be2, m2, v2 = bn(ks[8], ks[9], ks[10], ks[11])
    return dict(w1=w1, b1=b1, gamma1=g1, beta1=be1, mean1=m1, var1=v1,
                w2=w2, b2=b2, gamma2=g2, beta2=be2, mean2=m2, var2=v2)


# --------------------------------------------------------------------------------------
# References
# --------------------------------------------------------------------------------------
def _reference_module_f32(x, p, eps=1e-5):
    """Pure-f32 reference matching the PyTorch module in eval mode."""
    def bn(y, g, b, m, v):
        return (y - m) / jnp.sqrt(v + eps) * g + b
    h = bn(x @ p["w1"] + p["b1"], p["gamma1"], p["beta1"], p["mean1"], p["var1"])
    h = h * jax.nn.sigmoid(h)
    y = bn(h @ p["w2"] + p["b2"], p["gamma2"], p["beta2"], p["mean2"], p["var2"])
    y = x + y
    return y * jax.nn.sigmoid(y)


def _reference_mixed(x, p, eps=1e-5):
    """Reference mirroring the kernel's mixed precision (bf16 matmul operands, f32 rest)."""
    s1, t1 = _fold_bn(p["gamma1"], p["beta1"], p["mean1"], p["var1"], p["b1"], eps)
    s2, t2 = _fold_bn(p["gamma2"], p["beta2"], p["mean2"], p["var2"], p["b2"], eps)
    h = jnp.dot(x.astype(jnp.bfloat16), p["w1"].astype(jnp.bfloat16),
                preferred_element_type=jnp.float32)
    h = h * s1 + t1
    h = h * jax.nn.sigmoid(h)
    y = jnp.dot(h.astype(jnp.bfloat16), p["w2"].astype(jnp.bfloat16),
                preferred_element_type=jnp.float32)
    y = y * s2 + t2
    y = y + x                                        # f32 residual skip
    return y * jax.nn.sigmoid(y)


if __name__ == "__main__":
    HIDDEN = 32

    key = jax.random.PRNGKey(0)
    kp, kx1, kx2 = jax.random.split(key, 3)
    params = init_params(kp, HIDDEN)
    prep = prepare_params(params)          # one-time BN fold + weight pad/cast (hoisted)

    fwd = jax.jit(residual_block_forward)

    # Small batch (single tile; exercises lane padding 32 -> 128 and the masked edge block).
    x1 = jax.random.normal(kx1, (8, HIDDEN), jnp.float32)
    y1 = jax.block_until_ready(fwd(x1, prep))

    # Larger batch (ragged last tile on the parallel batch grid: 600 = 512 + 88).
    x2 = jax.random.normal(kx2, (600, HIDDEN), jnp.float32)
    y2 = jax.block_until_ready(fwd(x2, prep))

    for x, y in ((x1, y1), (x2, y2)):
        assert y.shape == x.shape
        yf = y.astype(jnp.float32)
        y_mixed = _reference_mixed(x, params)     # same numerics as the kernel (bf16 matmuls)
        y_f32 = _reference_module_f32(x, params)  # full-precision module semantics
        assert jnp.allclose(yf, y_mixed, atol=3e-2, rtol=3e-2)
        assert jnp.allclose(yf, y_f32, atol=7e-2, rtol=7e-2)

    print("KERNEL_OK")
</pallas_src>

<mosaic_0001>
module attributes {stable_mosaic.version = 11 : i64} {
  func.func @residual_block_kernel(%arg0: i32, %arg1: memref<8x128xf32, #tpu.memory_space<vmem>>, %arg2: memref<128x128xbf16, #tpu.memory_space<vmem>>, %arg3: memref<1x128xf32, #tpu.memory_space<vmem>>, %arg4: memref<1x128xf32, #tpu.memory_space<vmem>>, %arg5: memref<128x128xbf16, #tpu.memory_space<vmem>>, %arg6: memref<1x128xf32, #tpu.memory_space<vmem>>, %arg7: memref<1x128xf32, #tpu.memory_space<vmem>>, %arg8: memref<8x128xbf16, #tpu.memory_space<vmem>>) attributes {dimension_semantics = [#tpu.dimension_semantics<parallel>], iteration_bounds = array<i64: 1>, scalar_prefetch = 0 : i64, scratch_operands = 0 : i64, tpu.core_type = #tpu.core_type<tc>, window_params = [{transform_indices = @transform_0, window_bounds = array<i64: 8, 128>}, {pipeline_mode = #tpu.pipeline_mode<synchronous>, transform_indices = @transform_1, window_bounds = array<i64: 128, 128>}, {pipeline_mode = #tpu.pipeline_mode<synchronous>, transform_indices = @transform_2, window_bounds = array<i64: 1, 128>}, {pipeline_mode = #tpu.pipeline_mode<synchronous>, transform_indices = @transform_3, window_bounds = array<i64: 1, 128>}, {pipeline_mode = #tpu.pipeline_mode<synchronous>, transform_indices = @transform_4, window_bounds = array<i64: 128, 128>}, {pipeline_mode = #tpu.pipeline_mode<synchronous>, transform_indices = @transform_5, window_bounds = array<i64: 1, 128>}, {pipeline_mode = #tpu.pipeline_mode<synchronous>, transform_indices = @transform_6, window_bounds = array<i64: 1, 128>}, {transform_indices = @transform_7, window_bounds = array<i64: 8, 128>}]} {
    %c0 = arith.constant 0 : index
    %c0_0 = arith.constant 0 : index
    %0 = vector.load %arg1[%c0, %c0_0] : memref<8x128xf32, #tpu.memory_space<vmem>>, vector<8x128xf32>
    %1 = arith.truncf %0 : vector<8x128xf32> to vector<8x128xbf16>
    %c0_1 = arith.constant 0 : index
    %c0_2 = arith.constant 0 : index
    %2 = vector.load %arg2[%c0_1, %c0_2] : memref<128x128xbf16, #tpu.memory_space<vmem>>, vector<128x128xbf16>
    %cst = arith.constant dense<0.000000e+00> : vector<8x128xf32>
    %3 = tpu.matmul %1, %2, %cst {dimension_numbers = #tpu.dot_dimension_numbers<[1], [0], [0], [1], [0, 0, 1, 1], [], []>} : vector<8x128xbf16>, vector<128x128xbf16>, vector<8x128xf32> -> vector<8x128xf32>
    %c0_3 = arith.constant 0 : index
    %c0_4 = arith.constant 0 : index
    %4 = vector.load %arg3[%c0_3, %c0_4] : memref<1x128xf32, #tpu.memory_space<vmem>>, vector<1x128xf32>
    %5 = vector.broadcast %4 : vector<1x128xf32> to vector<8x128xf32>
    %6 = arith.mulf %3, %5 : vector<8x128xf32>
    %c0_5 = arith.constant 0 : index
    %c0_6 = arith.constant 0 : index
    %7 = vector.load %arg4[%c0_5, %c0_6] : memref<1x128xf32, #tpu.memory_space<vmem>>, vector<1x128xf32>
    %8 = vector.broadcast %7 : vector<1x128xf32> to vector<8x128xf32>
    %9 = arith.addf %6, %8 : vector<8x128xf32>
    %cst_7 = arith.constant 0.000000e+00 : f32
    %10 = vector.broadcast %cst_7 : f32 to vector<8x128xf32>
    %11 = arith.subf %10, %9 : vector<8x128xf32>
    %12 = math.exp %11 : vector<8x128xf32>
    %cst_8 = arith.constant 1.000000e+00 : f32
    %13 = vector.broadcast %cst_8 : f32 to vector<8x128xf32>
    %14 = arith.addf %13, %12 : vector<8x128xf32>
    %15 = tpu.reciprocal %14 {approx = true} : vector<8x128xf32> -> vector<8x128xf32>
    %16 = arith.mulf %9, %15 : vector<8x128xf32>
    %17 = arith.truncf %16 : vector<8x128xf32> to vector<8x128xbf16>
    %c0_9 = arith.constant 0 : index
    %c0_10 = arith.constant 0 : index
    %18 = vector.load %arg5[%c0_9, %c0_10] : memref<128x128xbf16, #tpu.memory_space<vmem>>, vector<128x128xbf16>
    %cst_11 = arith.constant dense<0.000000e+00> : vector<8x128xf32>
    %19 = tpu.matmul %17, %18, %cst_11 {dimension_numbers = #tpu.dot_dimension_numbers<[1], [0], [0], [1], [0, 0, 1, 1], [], []>} : vector<8x128xbf16>, vector<128x128xbf16>, vector<8x128xf32> -> vector<8x128xf32>
    %c0_12 = arith.constant 0 : index
    %c0_13 = arith.constant 0 : index
    %20 = vector.load %arg6[%c0_12, %c0_13] : memref<1x128xf32, #tpu.memory_space<vmem>>, vector<1x128xf32>
    %21 = vector.broadcast %20 : vector<1x128xf32> to vector<8x128xf32>
    %22 = arith.mulf %19, %21 : vector<8x128xf32>
    %c0_14 = arith.constant 0 : index
    %c0_15 = arith.constant 0 : index
    %23 = vector.load %arg7[%c0_14, %c0_15] : memref<1x128xf32, #tpu.memory_space<vmem>>, vector<1x128xf32>
    %24 = vector.broadcast %23 : vector<1x128xf32> to vector<8x128xf32>
    %25 = arith.addf %22, %24 : vector<8x128xf32>
    %26 = arith.addf %25, %0 : vector<8x128xf32>
    %cst_16 = arith.constant 0.000000e+00 : f32
    %27 = vector.broadcast %cst_16 : f32 to vector<8x128xf32>
    %28 = arith.subf %27, %26 : vector<8x128xf32>
    %29 = math.exp %28 : vector<8x128xf32>
    %cst_17 = arith.constant 1.000000e+00 : f32
    %30 = vector.broadcast %cst_17 : f32 to vector<8x128xf32>
    %31 = arith.addf %30, %29 : vector<8x128xf32>
    %32 = tpu.reciprocal %31 {approx = true} : vector<8x128xf32> -> vector<8x128xf32>
    %33 = arith.mulf %26, %32 : vector<8x128xf32>
    %34 = arith.truncf %33 : vector<8x128xf32> to vector<8x128xbf16>
    %c0_18 = arith.constant 0 : index
    %c0_19 = arith.constant 0 : index
    %35 = vector.load %arg8[%c0_18, %c0_19] : memref<8x128xbf16, #tpu.memory_space<vmem>>, vector<8x128xbf16>
    tpu.vector_store %arg8[%c0_18, %c0_19], %34 {strides = array<i32>} : memref<8x128xbf16, #tpu.memory_space<vmem>>, vector<8x128xbf16>,
    return
  }
  func.func @transform_0(%arg0: i32) -> (i32, i32) {
    %c0_i32 = arith.constant 0 : i32
    %c0_i32_0 = arith.constant 0 : i32
    return %arg0, %c0_i32 : i32, i32
  }
  func.func @transform_1(%arg0: i32) -> (i32, i32) {
    %c0_i32 = arith.constant 0 : i32
    %c0_i32_0 = arith.constant 0 : i32
    %c0_i32_1 = arith.constant 0 : i32
    return %c0_i32, %c0_i32_0 : i32, i32
  }
  func.func @transform_2(%arg0: i32) -> (i32, i32) {
    %c0_i32 = arith.constant 0 : i32
    %c0_i32_0 = arith.constant 0 : i32
    %c0_i32_1 = arith.constant 0 : i32
    return %c0_i32, %c0_i32_0 : i32, i32
  }
  func.func @transform_3(%arg0: i32) -> (i32, i32) {
    %c0_i32 = arith.constant 0 : i32
    %c0_i32_0 = arith.constant 0 : i32
    %c0_i32_1 = arith.constant 0 : i32
    return %c0_i32, %c0_i32_0 : i32, i32
  }
  func.func @transform_4(%arg0: i32) -> (i32, i32) {
    %c0_i32 = arith.constant 0 : i32
    %c0_i32_0 = arith.constant 0 : i32
    %c0_i32_1 = arith.constant 0 : i32
    return %c0_i32, %c0_i32_0 : i32, i32
  }
  func.func @transform_5(%arg0: i32) -> (i32, i32) {
    %c0_i32 = arith.constant 0 : i32
    %c0_i32_0 = arith.constant 0 : i32
    %c0_i32_1 = arith.constant 0 : i32
    return %c0_i32, %c0_i32_0 : i32, i32
  }
  func.func @transform_6(%arg0: i32) -> (i32, i32) {
    %c0_i32 = arith.constant 0 : i32
    %c0_i32_0 = arith.constant 0 : i32
    %c0_i32_1 = arith.constant 0 : i32
    return %c0_i32, %c0_i32_0 : i32, i32
  }
  func.func @transform_7(%arg0: i32) -> (i32, i32) {
    %c0_i32 = arith.constant 0 : i32
    %c0_i32_0 = arith.constant 0 : i32
    return %arg0, %c0_i32 : i32, i32
  }
}

</mosaic_0001>

<bundles_post_ra>
// kernel: residual_block_forward.1
= control target key start
LH: loop header
LB: loop body
LE: loop exit
PB: predicated region body
PF: predicated region fallthrough
CT: control target
= control target key end

     0   :  { %12 = vsyncpa [#allocation3], 0  ;;  %s609_s0 = inlined_call_operand.vmem [shape: f32[8,128], index: 0, kind: input, shape index: {}]   ;;  %s610_s1 = inlined_call_operand.hbm [shape: bf16[128,128], index: 1, kind: input, shape index: {}]   ;;  %s611_s2 = inlined_call_operand.vmem [shape: f32[1,128], index: 2, kind: input, shape index: {}]   ;;  %s612_s3 = inlined_call_operand.vmem [shape: f32[1,128], index: 3, kind: input, shape index: {}]   ;;  %s613_s4 = inlined_call_operand.hbm [shape: bf16[128,128], index: 4, kind: input, shape index: {}]   ;;  %s614_s5 = inlined_call_operand.vmem [shape: f32[1,128], index: 5, kind: input, shape index: {}]   ;;  %s615_s6 = inlined_call_operand.vmem [shape: f32[1,128], index: 6, kind: input, shape index: {}]   ;;  %s616_s7 = inlined_call_operand.hbm [shape: bf16[8,128], index: 7, kind: output, shape index: {}]  }
   0x1   :  { %13 = vsyncpa [#allocation6], 0 }
   0x2   :  { %14 = vsyncpa [#allocation4], 0  ;;  %s511_s24 = smov [#allocation2]   ;;  %s439_s28 = scalar_lea.hbm %s610_s1, 1024 }
   0x3   :  { %s22_s25 = sshll.u32 %s511_s24, 4  ;;  %p440_p0 = scmp.ne.s32.totalorder %s610_s1, %s439_s28  ;;  %s23_s25 = int_to_ptr.vmem [resolvable:$true] %s22_s25 }
   0x4   :  { %p443_p1 = scmp.lt.u32.totalorder %s439_s28, %s610_s1 }
   0x6   :  { %p445_p2 = pnand %p443_p1, %p440_p0 }
   0x8   :  { %448 = shalt.err (!%p445_p2)
}
   0x9   :  { %s449_s10 = scalar_lea.vmem %s23_s25, 1024  ;;  %p454_p4 = scmp.lt.s32.totalorder %s23_s25, %s23_s25 }
   0xa   :  { %p450_p3 = scmp.ne.s32.totalorder %s23_s25, %s449_s10  ;;  %p455_p5 = scmp.lt.s32.totalorder %s449_s10, %s449_s10 }
   0xc   :  { %p456_p6 = por %p455_p5, %p454_p4 }
   0xe   :  { %p457_p7 = pnand %p456_p6, %p450_p3 }
  0x10   :  { %460 = shalt.err (!%p457_p7)
}
  0x11   :  { %s512_s11 = smov 64   ;;  %s513_s12 = smov 4  }
  0x12   :  { %28 = dma.hbm_to_vmem [thread:$0]  %s610_s1, 1024, %s23_s25, [#allocation3], %s512_s11, %s512_s11, %s513_s12  }
  0x13   :  { %s514_s15 = smov [#allocation5]   ;;  %s461_s19 = scalar_lea.hbm %s613_s4, 1024 }
  0x14   :  { %s38_s16 = sshll.u32 %s514_s15, 4  ;;  %p462_p8 = scmp.ne.s32.totalorder %s613_s4, %s461_s19  ;;  %s39_s16 = int_to_ptr.vmem [resolvable:$true] %s38_s16 }
  0x15   :  { %p465_p9 = scmp.lt.u32.totalorder %s461_s19, %s613_s4 }
  0x17   :  { %p467_p10 = pnand %p465_p9, %p462_p8 }
  0x19   :  { %470 = shalt.err (!%p467_p10)
}
  0x1a   :  { %s471_s24 = scalar_lea.vmem %s39_s16, 1024  ;;  %p476_p12 = scmp.lt.s32.totalorder %s39_s16, %s39_s16 }
  0x1b   :  { %p472_p11 = scmp.ne.s32.totalorder %s39_s16, %s471_s24  ;;  %p477_p13 = scmp.lt.s32.totalorder %s471_s24, %s471_s24 }
  0x1d   :  { %p478_p0 = por %p477_p13, %p476_p12 }
  0x1f   :  { %p479_p1 = pnand %p478_p0, %p472_p11 }
  0x21   :  { %482 = shalt.err (!%p479_p1)
}
  0x22   :  { %44 = dma.hbm_to_vmem [thread:$0]  %s613_s4, 1024, %s39_s16, [#allocation6], %s512_s11, %s512_s11, %s513_s12  }
  0x23   :  { %505 = dma.done.wait [#allocation3], 1024  }
  0x24   :  { %506 = vsyncadd [#allocation3], 4294966272 }
  0x25   :  { %507 = dma.done.wait [#allocation6], 1024  }
  0x26   :  { %508 = vsyncadd [#allocation6], 4294966272  ;;  %v515_v0 = vmov 0.0   ;;  %vm516_vm0 = vmmov 0   ;;  %v415_v1 = vld [vmem:[#allocation2] sm:$0xff]   ;;  %v416_v2 = vld [vmem:[#allocation2 + $0x8] sm:$0xff]  }
  0x27   :  { %368 = vmatprep.subr.bf16.mxu0 %v515_v0  ;;  %384 = vmatprep.mubr.msk.bf16.mxu0 %vm516_vm0, %v515_v0  ;;  %v417_v3 = vld [vmem:[#allocation2 + $0x10] sm:$0xff]   ;;  %v418_v4 = vld [vmem:[#allocation2 + $0x18] sm:$0xff]   ;;  %v419_v5 = vld [vmem:[#allocation2 + $0x20] sm:$0xff]   ;;  %s517_s9 = smov [#allocation7]  }
  0x28   :  { %388 = vmatprep.subr.bf16.mxu1 %v515_v0  ;;  %404 = vmatprep.mubr.msk.bf16.mxu1 %vm516_vm0, %v515_v0  ;;  %v420_v6 = vld [vmem:[#allocation2 + $0x28] sm:$0xff]   ;;  %v421_v7 = vld [vmem:[#allocation2 + $0x30] sm:$0xff]   ;;  %v422_v8 = vld [vmem:[#allocation2 + $0x38] sm:$0xff]  }
  0x29   :  { %369 = vmatpush3.bf16.msra.mxu0 %v415_v1  ;;  %v56_v9 = vld [vmem:[%s609_s0] sm:$0xff]  ;;  %v424_v12 = vld [vmem:[#allocation5 + $0x8] sm:$0xff]   ;;  %v425_v13 = vld [vmem:[#allocation5 + $0x10] sm:$0xff]  }
  0x2a   :  { %370 = vmatprep.subr.bf16.mxu0 %v515_v0  ;;  %v57_v10 = vpack.c.bf16 %v56_v9, %v56_v9  ;;  %v423_v11 = vld [vmem:[#allocation5] sm:$0xff]   ;;  %v426_v14 = vld [vmem:[#allocation5 + $0x18] sm:$0xff]   ;;  %v428_v16 = vld [vmem:[#allocation5 + $0x28] sm:$0xff]  }
  0x2b   :  { %389 = vmatpush3.bf16.msra.mxu1 %v423_v11  ;;  %v427_v15 = vld [vmem:[#allocation5 + $0x20] sm:$0xff]   ;;  %v429_v17 = vld [vmem:[#allocation5 + $0x30] sm:$0xff]   ;;  %v430_v18 = vld [vmem:[#allocation5 + $0x38] sm:$0xff]  }
  0x2c   :  { %390 = vmatprep.subr.bf16.mxu1 %v515_v0  ;;  %v338_v19 = vld [vmem:[%s611_s2] ss:$0 sm:$0xff] }
  0x2d   :  { %371 = vmatpush3.bf16.msra.mxu0 %v416_v2  ;;  %v339_v21 = vld [vmem:[%s612_s3] ss:$0 sm:$0xff] }
  0x2e   :  { %372 = vmatprep.subr.bf16.mxu0 %v515_v0  ;;  %v348_v34 = vld [vmem:[%s614_s5] ss:$0 sm:$0xff]  ;;  %s320_s5 = sshll.u32 %s517_s9, 4  ;;  %s321_s5 = int_to_ptr.vmem [resolvable:$true] %s320_s5 }
  0x2f   :  { %391 = vmatpush3.bf16.msra.mxu1 %v424_v12  ;;  %v349_v36 = vld [vmem:[%s615_s6] ss:$0 sm:$0xff]  ;;  %s483_s6 = scalar_lea.vmem %s321_s5, 64  ;;  %p488_p3 = scmp.lt.s32.totalorder %s321_s5, %s321_s5 }
  0x30   :  { %392 = vmatprep.subr.bf16.mxu1 %v515_v0  ;;  %p484_p2 = scmp.ne.s32.totalorder %s321_s5, %s483_s6  ;;  %p489_p4 = scmp.lt.s32.totalorder %s483_s6, %s483_s6 }
  0x31   :  { %373 = vmatpush3.bf16.msra.mxu0 %v417_v3 }
  0x32   :  { %374 = vmatprep.subr.bf16.mxu0 %v515_v0  ;;  %p490_p5 = por %p489_p4, %p488_p3 }
  0x33   :  { %393 = vmatpush3.bf16.msra.mxu1 %v425_v13 }
  0x34   :  { %394 = vmatprep.subr.bf16.mxu1 %v515_v0  ;;  %p491_p6 = pnand %p490_p5, %p484_p2 }
  0x35   :  { %375 = vmatpush3.bf16.msra.mxu0 %v418_v4 }
  0x36   :  { %376 = vmatprep.subr.bf16.mxu0 %v515_v0 }
  0x37   :  { %395 = vmatpush3.bf16.msra.mxu1 %v426_v14 }
  0x38   :  { %396 = vmatprep.subr.bf16.mxu1 %v515_v0 }
  0x39   :  { %377 = vmatpush3.bf16.msra.mxu0 %v419_v5 }
  0x3a   :  { %378 = vmatprep.subr.bf16.mxu0 %v515_v0 }
  0x3b   :  { %397 = vmatpush3.bf16.msra.mxu1 %v427_v15 }
  0x3c   :  { %398 = vmatprep.subr.bf16.mxu1 %v515_v0 }
  0x3d   :  { %379 = vmatpush3.bf16.msra.mxu0 %v420_v6 }
  0x3e   :  { %380 = vmatprep.subr.bf16.mxu0 %v515_v0 }
  0x3f   :  { %399 = vmatpush3.bf16.msra.mxu1 %v428_v16 }
  0x40   :  { %400 = vmatprep.subr.bf16.mxu1 %v515_v0 }
  0x41   :  { %381 = vmatpush3.bf16.msra.mxu0 %v421_v7 }
  0x42   :  { %382 = vmatprep.subr.bf16.mxu0 %v515_v0 }
  0x43   :  { %401 = vmatpush3.bf16.msra.mxu1 %v429_v17 }
  0x44   :  { %402 = vmatprep.subr.bf16.mxu1 %v515_v0 }
  0x45   :  { %383 = vmatpush3.bf16.msra.mxu0 %v422_v8 }
  0x47   :  { %403 = vmatpush3.bf16.msra.mxu1 %v430_v18 }
  0x48   :  { %385 = vmatmul.mubr.bf16.vlgmr.msra.gmra.mrb[0].mxu0 %v57_v10 }
 0x11b   :  { %v156_v20 = vpop.f32.mrb[0].mxu0 }
 0x11c   :  { %v169_v22 = vmul.f32 %v338_v19, %v156_v20  ;;  %v386_v23 = vpop.f32.mrb[1].mxu0 }
 0x11d   :  { %v159_v24 = vpop.f32.mrb[2].mxu0 }
 0x11e   :  { %v177_v25 = vadd.f32 %v339_v21, %v169_v22  ;;  %v387_v26 = vpop.f32.mrb[3].mxu0 }
 0x120   :  { %v178_v27 = vsub.f32 0.0, %v177_v25 }
 0x122   :  { %v179_v28 = vmul.f32 1.442695, %v178_v27 }
 0x124   :  { %431 = vpow2.f32 %v179_v28 }
 0x12e   :  { %v432_v29 = vpop.eup %431 }
 0x12f   :  { %v181_v30 = vadd.f32 1.0, %v432_v29 }
 0x131   :  { %433 = vrcp.f32 %v181_v30 }
 0x13b   :  { %v434_v31 = vpop.eup %433 }
 0x13c   :  { %v183_v32 = vmul.f32 %v434_v31, %v177_v25 }
 0x13e   :  { %v184_v33 = vpack.c.bf16 %v183_v32, %v183_v32 }
 0x140   :  { %405 = vmatmul.mubr.bf16.vlgmr.msra.gmra.mrb[0].mxu1 %v184_v33 }
 0x213   :  { %v283_v35 = vpop.f32.mrb[0].mxu1 }
 0x214   :  { %v296_v37 = vmul.f32 %v348_v34, %v283_v35  ;;  %v406_v38 = vpop.f32.mrb[1].mxu1 }
 0x215   :  { %v286_v39 = vpop.f32.mrb[2].mxu1 }
 0x216   :  { %v304_v40 = vadd.f32 %v349_v36, %v296_v37  ;;  %v407_v41 = vpop.f32.mrb[3].mxu1 }
 0x218   :  { %v305_v42 = vadd.f32 %v304_v40, %v56_v9 }
 0x21a   :  { %v306_v43 = vsub.f32 0.0, %v305_v42 }
 0x21c   :  { %v307_v44 = vmul.f32 1.442695, %v306_v43 }
 0x21e   :  { %435 = vpow2.f32 %v307_v44 }
 0x228   :  { %v436_v45 = vpop.eup %435 }
 0x229   :  { %v309_v46 = vadd.f32 1.0, %v436_v45 }
 0x22b   :  { %437 = vrcp.f32 %v309_v46 }
 0x235   :  { %v438_v47 = vpop.eup %437 }
 0x236   :  { %v311_v48 = vmul.f32 %v438_v47, %v305_v42 }
 0x238   :  { %v312_v49 = vpack.c.bf16 %v311_v48, %v311_v48 }
 0x23a   :  { %313 = vst [vmem:[#allocation7] sm:$0xf] %v312_v49 }
 0x23b   :  { %494 = shalt.err (!%p491_p6)
}
 0x23c   :  { %s495_s12 = scalar_lea.hbm %s616_s7, 64 }
 0x23d   :  { %p496_p7 = scmp.ne.s32.totalorder %s616_s7, %s495_s12  ;;  %p499_p8 = scmp.lt.u32.totalorder %s495_s12, %s616_s7 }
 0x23f   :  { %p501_p9 = pnand %p499_p8, %p496_p7 }
 0x241   :  { %504 = shalt.err (!%p501_p9)
}
 0x242   :  { %323 = dma.vmem_to_hbm [thread:$0]  %s321_s5, 64, %s616_s7, [#allocation4]  }
 0x243   :  { %509 = dma.done.wait [#allocation4], 64  }
 0x244   :  { %510 = vsyncadd [#allocation4], 4294967232 }
 0x245   :  { %327 = vsyncpa [#allocation3], 1 }
 0x246   :  { %328 = vsyncpa [#allocation6], 1 }
 0x247   :  { %329 = vsyncpa [#allocation4], 1 }

</bundles_post_ra>
